<compile_context>
chip_gen: v7x
topology: tpu7x:2x2x1
jax: 0.10.0
libtpu: 0.0.40
codegen_flags: <defaults>
</compile_context>

<pallas_src>
import jax
import jax.numpy as jnp
from jax.experimental import pallas as pl
from jax.experimental.pallas import tpu as pltpu


# ----------------------------------------------------------------------------
# Fused Pallas kernel: whole forward pass in one call
# ----------------------------------------------------------------------------
def _fused_forward_kernel(
    x_blk_ref,    # [N_r+N_i+N_e, F_tot]  block-diag features
    a_cat_ref,    # [N_d, N_r+N_i+N_e]    concatenated incidence
    adj_ref,      # [N_d, N_d]            d2d adjacency pre-weighted by d_edge
    m_pool_ref,   # [B, N_d]              graph-membership (SumPooling)
    w_cat_ref,    # [F_tot, H]            stacked embedding weights
    w_gcn_ref,    # [L, H, H]             stacked GCN weights
    w_score_ref,  # [1, H]                score projection (row vector)
    head_ref,     # SMEM (4,)             [ln_gamma, ln_beta, lin_w, lin_b]
    o_ref,        # [B, 1]
):
    f32 = jnp.float32

    # ---- Fused embed + message passing onto d_nd nodes: 2 matmuls ----
    #   h_d = [A_r2d@r_node | A_i2d@i_node | A_e2d@r_edge] @ vstack(W_r,W_i,W_e)
    agg = jnp.dot(a_cat_ref[...], x_blk_ref[...], preferred_element_type=f32)
    h_d = jnp.dot(agg, w_cat_ref[...], preferred_element_type=f32)       # [N_d, H]

    adj = adj_ref[...]

    # ---- GCN stack (statically unrolled; dropout is eval-mode no-op) ----
    num_layers = w_gcn_ref.shape[0]
    for l in range(num_layers):
        m = jnp.dot(adj, h_d, preferred_element_type=f32)
        z = jnp.dot(m, w_gcn_ref[l], preferred_element_type=f32)
        h_d = jnp.maximum(z, 0.01 * z)  # LeakyReLU(negative_slope=0.01)

    # ---- SumPooling then score projection ----
    # pool first keeps the lane-dense [B, H] intermediate; the N=1 projection
    # is done on the VPU/XLU (mul + lane reduce) instead of an MXU matmul.
    pooled = jnp.dot(m_pool_ref[...], h_d, preferred_element_type=f32)    # [B, H]
    score = jnp.sum(pooled * w_score_ref[...], axis=-1, keepdims=True)    # [B, 1]

    # ---- LayerNorm(normalized_shape=1) -> Tanh -> Linear(1, 1) ----
    # scalars from SMEM; mean over last dim (size 1) == score, var == 0
    eps = 1e-5
    gamma = head_ref[0]
    beta = head_ref[1]
    lin_w = head_ref[2]
    lin_b = head_ref[3]
    mean = score
    var = jnp.zeros_like(score)
    normed = (score - mean) * jax.lax.rsqrt(var + eps)
    y = jnp.tanh(normed * gamma + beta)               # func_f = Tanh (default)
    o_ref[...] = y * lin_w + lin_b                    # Linear(1, 1)


# ----------------------------------------------------------------------------
# network forward: single fused pallas_call, jitted at the call site
# ----------------------------------------------------------------------------
@jax.jit
def network_forward(params, graph, r_node, i_node, r_edge, d_edge):
    A_r2d, A_i2d, A_e2d, A_d2d, M_pool = graph
    B = M_pool.shape[0]

    # .float() mirror (no-op if already f32)
    r_node = r_node.astype(jnp.float32)
    i_node = i_node.astype(jnp.float32)
    r_edge = r_edge.astype(jnp.float32)
    d_edge = d_edge.astype(jnp.float32)

    N_r, node_dim = r_node.shape
    N_i = i_node.shape[0]
    N_e, edge_dim = r_edge.shape
    F_tot = node_dim + 1 + edge_dim

    # Block-diagonal feature matrix (layout plumbing, done in the wrapper so the
    # kernel sees a single fused embed+aggregate pair of matmuls).
    x_blk = jnp.zeros((N_r + N_i + N_e, F_tot), jnp.float32)
    x_blk = x_blk.at[:N_r, :node_dim].set(r_node)
    x_blk = x_blk.at[N_r:N_r + N_i, node_dim:node_dim + 1].set(i_node)
    x_blk = x_blk.at[N_r + N_i:, node_dim + 1:].set(r_edge)

    # Concatenated incidence and pre-weighted d2d adjacency.
    a_cat = jnp.concatenate([A_r2d, A_i2d, A_e2d], axis=1)   # [N_d, N_r+N_i+N_e]
    adj_w = A_d2d * d_edge                                    # [N_d, N_d]

    # Stacked embedding weights [F_tot, H].
    w_cat = jnp.concatenate(
        [params["W_rnode"], params["W_inode"], params["W_edge"]], axis=0)

    # Packed head scalars -> one SMEM (4,) array.
    head = jnp.stack([
        params["ln_gamma"].reshape(()),
        params["ln_beta"].reshape(()),
        params["lin_w"].reshape(()),
        params["lin_b"].reshape(()),
    ]).astype(jnp.float32)

    w_score_row = params["w_score"].reshape(1, -1)            # [1, H]

    args = (x_blk, a_cat, adj_w, M_pool, w_cat, params["W_gcn"],
            w_score_row, head)

    vmem = pl.BlockSpec(memory_space=pltpu.MemorySpace.VMEM)
    smem = pl.BlockSpec(memory_space=pltpu.MemorySpace.SMEM)

    return pl.pallas_call(
        _fused_forward_kernel,
        out_shape=jax.ShapeDtypeStruct((B, 1), jnp.float32),
        in_specs=[vmem] * 7 + [smem],
        out_specs=vmem,
    )(*args)


# ----------------------------------------------------------------------------
# Deterministic parameter / input construction
# ----------------------------------------------------------------------------
def make_params(key, node_dim, edge_dim, hidden_dim, gcn_layers):
    keys = jax.random.split(key, 5 + gcn_layers)
    params = {
        "W_rnode": jax.random.normal(keys[0], (node_dim, hidden_dim), jnp.float32) * 0.1,
        "W_inode": jax.random.normal(keys[1], (1, hidden_dim), jnp.float32) * 0.1,
        "W_edge":  jax.random.normal(keys[2], (edge_dim, hidden_dim), jnp.float32) * 0.1,
        "w_score": jax.random.normal(keys[3], (hidden_dim, 1), jnp.float32) * 0.1,
        # stacked GCN weights: [L, H, H]
        "W_gcn":   jnp.stack([
            jax.random.normal(keys[5 + l], (hidden_dim, hidden_dim), jnp.float32) * 0.1
            for l in range(gcn_layers)
        ], axis=0),
        "ln_gamma": jnp.ones((1,), jnp.float32),
        "ln_beta":  jnp.zeros((1,), jnp.float32),
        "lin_w":    jax.random.normal(keys[4], (1, 1), jnp.float32) * 0.1,
        "lin_b":    jnp.zeros((1,), jnp.float32),
    }
    return params


if __name__ == "__main__":
    # config
    node_dim, edge_dim = 4, 5
    hidden_dim = 32
    gcn_layers = 4
    B = 2            # batch of graphs
    N_r, N_i, N_e, N_d = 16, 8, 20, 12

    key = jax.random.PRNGKey(0)
    k_in, k_graph, k_par = jax.random.split(key, 3)
    ki = jax.random.split(k_in, 4)
    kg = jax.random.split(k_graph, 5)

    # node / edge features
    r_node = jax.random.normal(ki[0], (N_r, node_dim), jnp.float32)
    i_node = jax.random.normal(ki[1], (N_i, 1), jnp.float32)
    r_edge = jax.random.normal(ki[2], (N_e, edge_dim), jnp.float32)
    d_edge = jax.random.uniform(ki[3], (N_d, N_d), jnp.float32)  # d2d edge weights

    # dense graph structure (0/1 incidence / adjacency matrices)
    A_r2d = (jax.random.uniform(kg[0], (N_d, N_r)) > 0.7).astype(jnp.float32)
    A_i2d = (jax.random.uniform(kg[1], (N_d, N_i)) > 0.7).astype(jnp.float32)
    A_e2d = (jax.random.uniform(kg[2], (N_d, N_e)) > 0.7).astype(jnp.float32)
    A_d2d = (jax.random.uniform(kg[3], (N_d, N_d)) > 0.6).astype(jnp.float32)
    # batch membership: first half of dot-nodes -> graph 0, rest -> graph 1
    seg = jnp.array([0] * (N_d // 2) + [1] * (N_d - N_d // 2))
    M_pool = (seg[None, :] == jnp.arange(B)[:, None]).astype(jnp.float32)

    graph = (A_r2d, A_i2d, A_e2d, A_d2d, M_pool)
    params = make_params(k_par, node_dim, edge_dim, hidden_dim, gcn_layers)

    out = network_forward(params, graph, r_node, i_node, r_edge, d_edge)
    out = jax.block_until_ready(out)
    assert out.shape == (B, 1)
    print("KERNEL_OK")
</pallas_src>

<mosaic_0001>
module attributes {stable_mosaic.version = 11 : i64} {
  func.func @_fused_forward_kernel(%arg0: memref<44x10xf32, #tpu.memory_space<vmem>>, %arg1: memref<12x44xf32, #tpu.memory_space<vmem>>, %arg2: memref<12x12xf32, #tpu.memory_space<vmem>>, %arg3: memref<2x12xf32, #tpu.memory_space<vmem>>, %arg4: memref<10x32xf32, #tpu.memory_space<vmem>>, %arg5: memref<4x32x32xf32, #tpu.memory_space<vmem>>, %arg6: memref<1x32xf32, #tpu.memory_space<vmem>>, %arg7: memref<4xf32, #tpu.memory_space<smem>>, %arg8: memref<2x1xf32, #tpu.memory_space<vmem>>) attributes {dimension_semantics = [], scalar_prefetch = 0 : i64, scratch_operands = 0 : i64, tpu.core_type = #tpu.core_type<tc>} {
    %c0 = arith.constant 0 : index
    %c0_0 = arith.constant 0 : index
    %0 = vector.load %arg1[%c0, %c0_0] : memref<12x44xf32, #tpu.memory_space<vmem>>, vector<12x44xf32>
    %c0_1 = arith.constant 0 : index
    %c0_2 = arith.constant 0 : index
    %1 = vector.load %arg0[%c0_1, %c0_2] : memref<44x10xf32, #tpu.memory_space<vmem>>, vector<44x10xf32>
    %cst = arith.constant dense<0.000000e+00> : vector<12x10xf32>
    %2 = tpu.matmul %0, %1, %cst {dimension_numbers = #tpu.dot_dimension_numbers<[1], [0], [0], [1], [0, 0, 1, 1], [], []>} : vector<12x44xf32>, vector<44x10xf32>, vector<12x10xf32> -> vector<12x10xf32>
    %c0_3 = arith.constant 0 : index
    %c0_4 = arith.constant 0 : index
    %3 = vector.load %arg4[%c0_3, %c0_4] : memref<10x32xf32, #tpu.memory_space<vmem>>, vector<10x32xf32>
    %cst_5 = arith.constant dense<0.000000e+00> : vector<12x32xf32>
    %4 = tpu.matmul %2, %3, %cst_5 {dimension_numbers = #tpu.dot_dimension_numbers<[1], [0], [0], [1], [0, 0, 1, 1], [], []>} : vector<12x10xf32>, vector<10x32xf32>, vector<12x32xf32> -> vector<12x32xf32>
    %c0_6 = arith.constant 0 : index
    %c0_7 = arith.constant 0 : index
    %5 = vector.load %arg2[%c0_6, %c0_7] : memref<12x12xf32, #tpu.memory_space<vmem>>, vector<12x12xf32>
    %cst_8 = arith.constant dense<0.000000e+00> : vector<12x32xf32>
    %6 = tpu.matmul %5, %4, %cst_8 {dimension_numbers = #tpu.dot_dimension_numbers<[1], [0], [0], [1], [0, 0, 1, 1], [], []>} : vector<12x12xf32>, vector<12x32xf32>, vector<12x32xf32> -> vector<12x32xf32>
    %c0_9 = arith.constant 0 : index
    %c0_10 = arith.constant 0 : index
    %c0_11 = arith.constant 0 : index
    %7 = vector.load %arg5[%c0_9, %c0_10, %c0_11] : memref<4x32x32xf32, #tpu.memory_space<vmem>>, vector<1x32x32xf32>
    %8 = vector.shape_cast %7 : vector<1x32x32xf32> to vector<32x32xf32>
    %cst_12 = arith.constant dense<0.000000e+00> : vector<12x32xf32>
    %9 = tpu.matmul %6, %8, %cst_12 {dimension_numbers = #tpu.dot_dimension_numbers<[1], [0], [0], [1], [0, 0, 1, 1], [], []>} : vector<12x32xf32>, vector<32x32xf32>, vector<12x32xf32> -> vector<12x32xf32>
    %cst_13 = arith.constant 0.00999999977 : f32
    %10 = vector.broadcast %cst_13 : f32 to vector<12x32xf32>
    %11 = arith.mulf %10, %9 : vector<12x32xf32>
    %12 = arith.maximumf %9, %11 : vector<12x32xf32>
    %cst_14 = arith.constant dense<0.000000e+00> : vector<12x32xf32>
    %13 = tpu.matmul %5, %12, %cst_14 {dimension_numbers = #tpu.dot_dimension_numbers<[1], [0], [0], [1], [0, 0, 1, 1], [], []>} : vector<12x12xf32>, vector<12x32xf32>, vector<12x32xf32> -> vector<12x32xf32>
    %c1 = arith.constant 1 : index
    %c0_15 = arith.constant 0 : index
    %c0_16 = arith.constant 0 : index
    %14 = vector.load %arg5[%c1, %c0_15, %c0_16] : memref<4x32x32xf32, #tpu.memory_space<vmem>>, vector<1x32x32xf32>
    %15 = vector.shape_cast %14 : vector<1x32x32xf32> to vector<32x32xf32>
    %cst_17 = arith.constant dense<0.000000e+00> : vector<12x32xf32>
    %16 = tpu.matmul %13, %15, %cst_17 {dimension_numbers = #tpu.dot_dimension_numbers<[1], [0], [0], [1], [0, 0, 1, 1], [], []>} : vector<12x32xf32>, vector<32x32xf32>, vector<12x32xf32> -> vector<12x32xf32>
    %cst_18 = arith.constant 0.00999999977 : f32
    %17 = vector.broadcast %cst_18 : f32 to vector<12x32xf32>
    %18 = arith.mulf %17, %16 : vector<12x32xf32>
    %19 = arith.maximumf %16, %18 : vector<12x32xf32>
    %cst_19 = arith.constant dense<0.000000e+00> : vector<12x32xf32>
    %20 = tpu.matmul %5, %19, %cst_19 {dimension_numbers = #tpu.dot_dimension_numbers<[1], [0], [0], [1], [0, 0, 1, 1], [], []>} : vector<12x12xf32>, vector<12x32xf32>, vector<12x32xf32> -> vector<12x32xf32>
    %c2 = arith.constant 2 : index
    %c0_20 = arith.constant 0 : index
    %c0_21 = arith.constant 0 : index
    %21 = vector.load %arg5[%c2, %c0_20, %c0_21] : memref<4x32x32xf32, #tpu.memory_space<vmem>>, vector<1x32x32xf32>
    %22 = vector.shape_cast %21 : vector<1x32x32xf32> to vector<32x32xf32>
    %cst_22 = arith.constant dense<0.000000e+00> : vector<12x32xf32>
    %23 = tpu.matmul %20, %22, %cst_22 {dimension_numbers = #tpu.dot_dimension_numbers<[1], [0], [0], [1], [0, 0, 1, 1], [], []>} : vector<12x32xf32>, vector<32x32xf32>, vector<12x32xf32> -> vector<12x32xf32>
    %cst_23 = arith.constant 0.00999999977 : f32
    %24 = vector.broadcast %cst_23 : f32 to vector<12x32xf32>
    %25 = arith.mulf %24, %23 : vector<12x32xf32>
    %26 = arith.maximumf %23, %25 : vector<12x32xf32>
    %cst_24 = arith.constant dense<0.000000e+00> : vector<12x32xf32>
    %27 = tpu.matmul %5, %26, %cst_24 {dimension_numbers = #tpu.dot_dimension_numbers<[1], [0], [0], [1], [0, 0, 1, 1], [], []>} : vector<12x12xf32>, vector<12x32xf32>, vector<12x32xf32> -> vector<12x32xf32>
    %c3 = arith.constant 3 : index
    %c0_25 = arith.constant 0 : index
    %c0_26 = arith.constant 0 : index
    %28 = vector.load %arg5[%c3, %c0_25, %c0_26] : memref<4x32x32xf32, #tpu.memory_space<vmem>>, vector<1x32x32xf32>
    %29 = vector.shape_cast %28 : vector<1x32x32xf32> to vector<32x32xf32>
    %cst_27 = arith.constant dense<0.000000e+00> : vector<12x32xf32>
    %30 = tpu.matmul %27, %29, %cst_27 {dimension_numbers = #tpu.dot_dimension_numbers<[1], [0], [0], [1], [0, 0, 1, 1], [], []>} : vector<12x32xf32>, vector<32x32xf32>, vector<12x32xf32> -> vector<12x32xf32>
    %cst_28 = arith.constant 0.00999999977 : f32
    %31 = vector.broadcast %cst_28 : f32 to vector<12x32xf32>
    %32 = arith.mulf %31, %30 : vector<12x32xf32>
    %33 = arith.maximumf %30, %32 : vector<12x32xf32>
    %c0_29 = arith.constant 0 : index
    %c0_30 = arith.constant 0 : index
    %34 = vector.load %arg3[%c0_29, %c0_30] : memref<2x12xf32, #tpu.memory_space<vmem>>, vector<2x12xf32>
    %cst_31 = arith.constant dense<0.000000e+00> : vector<2x32xf32>
    %35 = tpu.matmul %34, %33, %cst_31 {dimension_numbers = #tpu.dot_dimension_numbers<[1], [0], [0], [1], [0, 0, 1, 1], [], []>} : vector<2x12xf32>, vector<12x32xf32>, vector<2x32xf32> -> vector<2x32xf32>
    %c0_32 = arith.constant 0 : index
    %c0_33 = arith.constant 0 : index
    %36 = vector.load %arg6[%c0_32, %c0_33] : memref<1x32xf32, #tpu.memory_space<vmem>>, vector<1x32xf32>
    %37 = vector.broadcast %36 : vector<1x32xf32> to vector<2x32xf32>
    %38 = arith.mulf %35, %37 : vector<2x32xf32>
    %cst_34 = arith.constant dense<0.000000e+00> : vector<2xf32>
    %39 = vector.multi_reduction <add>, %38, %cst_34 [1] : vector<2x32xf32> to vector<2xf32>
    %40 = vector.shape_cast %39 : vector<2xf32> to vector<2x1xf32>
    %c0_35 = arith.constant 0 : index
    %41 = memref.load %arg7[%c0_35] : memref<4xf32, #tpu.memory_space<smem>>
    %c1_36 = arith.constant 1 : index
    %42 = memref.load %arg7[%c1_36] : memref<4xf32, #tpu.memory_space<smem>>
    %c2_37 = arith.constant 2 : index
    %43 = memref.load %arg7[%c2_37] : memref<4xf32, #tpu.memory_space<smem>>
    %c3_38 = arith.constant 3 : index
    %44 = memref.load %arg7[%c3_38] : memref<4xf32, #tpu.memory_space<smem>>
    %cst_39 = arith.constant 0.000000e+00 : f32
    %45 = vector.broadcast %cst_39 : f32 to vector<2x1xf32>
    %46 = arith.subf %40, %40 : vector<2x1xf32>
    %cst_40 = arith.constant 9.99999974E-6 : f32
    %47 = vector.broadcast %cst_40 : f32 to vector<2x1xf32>
    %48 = arith.addf %45, %47 : vector<2x1xf32>
    %49 = math.rsqrt %48 : vector<2x1xf32>
    %50 = arith.mulf %46, %49 : vector<2x1xf32>
    %51 = vector.broadcast %41 : f32 to vector<2x1xf32>
    %52 = arith.mulf %50, %51 : vector<2x1xf32>
    %53 = vector.broadcast %42 : f32 to vector<2x1xf32>
    %54 = arith.addf %52, %53 : vector<2x1xf32>
    %55 = math.tanh %54 : vector<2x1xf32>
    %56 = vector.broadcast %43 : f32 to vector<2x1xf32>
    %57 = arith.mulf %55, %56 : vector<2x1xf32>
    %58 = vector.broadcast %44 : f32 to vector<2x1xf32>
    %59 = arith.addf %57, %58 : vector<2x1xf32>
    %c0_41 = arith.constant 0 : index
    %c0_42 = arith.constant 0 : index
    %60 = vector.load %arg8[%c0_41, %c0_42] : memref<2x1xf32, #tpu.memory_space<vmem>>, vector<2x1xf32>
    tpu.vector_store %arg8[%c0_41, %c0_42], %59 {strides = array<i32>} : memref<2x1xf32, #tpu.memory_space<vmem>>, vector<2x1xf32>,
    return
  }
}

</mosaic_0001>

<bundles_post_ra>
// kernel: mul.1
= control target key start
LH: loop header
LB: loop body
LE: loop exit
PB: predicated region body
PF: predicated region fallthrough
CT: control target
= control target key end

     0   :  { %s56_s0 = inlined_call_operand.vmem [shape: f32[12,12], index: 0, kind: input, shape index: {}]   ;;  %s57_s1 = inlined_call_operand.vmem [shape: f32[12,12], index: 1, kind: input, shape index: {}]   ;;  %s58_s2 = inlined_call_operand.vmem [shape: f32[12,12], index: 2, kind: output, shape index: {}]  }
   0x1   :  { %v3_v0 = vld [vmem:[%s56_s0] sm:$0xff]  ;;  %v20_v2 = vld [vmem:[%s56_s0 + $0x8] sm:$0xff] }
   0x2   :  { %v4_v1 = vld [vmem:[%s57_s1] sm:$0xff]  ;;  %v21_v4 = vld [vmem:[%s57_s1 + $0x8] sm:$0xff] }
   0x3   :  { %v7_v3 = vmul.f32 %v4_v1, %v3_v0  ;;  %v16_v5 = vmul.f32 %v21_v4, %v20_v2 }
   0x5   :  { %9 = vst [vmem:[%s58_s2] sm:$0xff] %v7_v3  ;;  %22 = vst [vmem:[%s58_s2 + $0x8] sm:$0xff] %v16_v5 }

// kernel: network_forward.1
= control target key start
LH: loop header
LB: loop body
LE: loop exit
PB: predicated region body
PF: predicated region fallthrough
CT: control target
= control target key end

     0   :  { %13 = vsyncpa [#allocation3], 0  ;;  %s1514_s0 = inlined_call_operand.vmem [shape: f32[44,10], index: 0, kind: input, shape index: {}]   ;;  %s1515_s1 = inlined_call_operand.vmem [shape: f32[12,44], index: 1, kind: input, shape index: {}]   ;;  %s1516_s2 = inlined_call_operand.vmem [shape: f32[12,12], index: 2, kind: input, shape index: {}]   ;;  %s1517_s3 = inlined_call_operand.vmem [shape: f32[2,12], index: 3, kind: input, shape index: {}]   ;;  %s1518_s4 = inlined_call_operand.vmem [shape: f32[10,32], index: 4, kind: input, shape index: {}]   ;;  %s1519_s5 = inlined_call_operand.vmem [shape: f32[4,32,32], index: 5, kind: input, shape index: {}]   ;;  %s1520_s6 = inlined_call_operand.vmem [shape: f32[1,32], index: 6, kind: input, shape index: {}]   ;;  %s1521_s7 = inlined_call_operand.vmem [shape: f32[4], index: 7, kind: input, shape index: {}]   ;;  %s1522_s8 = inlined_call_operand.vmem [shape: f32[2,1], index: 8, kind: output, shape index: {}]  }
   0x1   :  { %s34_s29 = sshll.u32 %s1521_s7, 4  ;;  %s35_s29 = int_to_ptr.vmem [resolvable:$true] %s34_s29 }
   0x2   :  { %s1303_s30 = scalar_lea.vmem %s35_s29, 16  ;;  %p1308_p1 = scmp.lt.s32.totalorder %s35_s29, %s35_s29 }
   0x3   :  { %p1304_p0 = scmp.ne.s32.totalorder %s35_s29, %s1303_s30  ;;  %p1309_p2 = scmp.lt.s32.totalorder %s1303_s30, %s1303_s30 }
   0x5   :  { %p1310_p3 = por %p1309_p2, %p1308_p1 }
   0x7   :  { %p1311_p4 = pnand %p1310_p3, %p1304_p0 }
   0x9   :  { %1314 = shalt.err (!%p1311_p4)
}
   0xa   :  { %s1317_s9 = smov [#allocation2]  }
   0xb   :  { %37 = dma.vmem_to_smem %s35_s29, 16, %s1317_s9, [#allocation3]  }
   0xc   :  { %1315 = dma.done.wait [#allocation3], 16  }
   0xd   :  { %1316 = vsyncadd [#allocation3], 4294967280 }
   0xe   :  { %41 = sfence }
   0xf   :  { %v44_v0 = vld [vmem:[%s1514_s0] sm:$0xff]  ;;  %v45_v1 = vld [vmem:[%s1514_s0 + $0x8] sm:$0xff]  ;;  %v46_v2 = vld [vmem:[%s1514_s0 + $0x10] sm:$0xff]  ;;  %vm50_vm0 = vcmask 359424   ;;  %vm145_vm1 = vcmask 1041408   ;;  %vm57_vm2 = vcmask 1043456  }
  0x10   :  { %v1216_v3 = vpack.c.bf16 %v45_v1, %v44_v0  ;;  %v47_v4 = vld [vmem:[%s1514_s0 + $0x18] sm:$0xff]  ;;  %v48_v6 = vld [vmem:[%s1514_s0 + $0x20] sm:$0xff]  ;;  %v49_v7 = vld [vmem:[%s1514_s0 + $0x28] sm:$0xf]  ;;  %vm1318_vm3 = vmmov 1   ;;  %vm138_vm6 = vcmask 80896  }
  0x11   :  { %v1220_v5 = vpack.c.bf16 %v47_v4, %v46_v2  ;;  %v42_v8 = vld [vmem:[%s1515_s1] sm:$0xff]  ;;  %v137_v10 = vld [vmem:[%s1518_s4 + $0x8] sm:$0x3]  ;;  %vm1231_vm4 = vmpackc.low %vm145_vm1, %vm1318_vm3  ;;  %v1224_v12 = vpack.c.bf16 %v49_v7, %v48_v6  ;;  %vm226_vm7 = vcmask 97280   ;;  %vm315_vm8 = vcmask 261120   ;;  %s1057_s15 = sld [smem:[#allocation2 + $0x1]] }
  0x12   :  { %1217 = vmatprep.subr.bf16.mxu0 %v1216_v3  ;;  %1127 = vmatprep.mubr.msk.f32.mxu0 %vm50_vm0, %v42_v8  ;;  %v136_v9 = vld [vmem:[%s1518_s4] sm:$0xff]  ;;  %vm1398_vm5 = vmpackc.low %vm57_vm2, %vm1318_vm3  ;;  %v43_v14 = vld [vmem:[%s1515_s1 + $0x8] sm:$0xf]  ;;  %vm1320_vm9 = vmmov 0   ;;  %vm990_vm10 = vcmask 254976   ;;  %s1059_s16 = sld [smem:[#allocation2 + $0x3]] }
  0x13   :  { %1219 = vmatpush3.bf16.msra.mxu0 %v1216_v3  ;;  %v1230_v11 = vpack.c.bf16 %v137_v10, %v136_v9  ;;  %v224_v17 = vld [vmem:[%s1516_s2] sm:$0xff]  ;;  %v312_v19 = vld [vmem:[%s1519_s5 + $0x8] sm:$0xff]  ;;  %v313_v24 = vld [vmem:[%s1519_s5 + $0x10] sm:$0xff]  ;;  %vm1009_vm11 = vcmask 1024  }
  0x14   :  { %1221 = vmatprep.subr.bf16.mxu0 %v1220_v5  ;;  %v311_v18 = vld [vmem:[%s1519_s5] sm:$0xff]  ;;  %v314_v25 = vld [vmem:[%s1519_s5 + $0x18] sm:$0xff]  ;;  %v1434_v26 = vld [vmem:[%s1516_s2 + $0x8] sm:$0xf]  ;;  %s994_s2 = sld [smem:[#allocation2]] }
  0x15   :  { %1232 = vmatprep.subr.msk.bf16.mxu1 %vm1231_vm4, %v1230_v11  ;;  %v1242_v23 = vpack.c.bf16 %v312_v19, %v311_v18  ;;  %v1246_v27 = vpack.c.bf16 %v314_v25, %v313_v24  ;;  %v1030_v35 = vld [vmem:[%s1519_s5 + $0x20] sm:$0xff]  ;;  %v1031_v36 = vld [vmem:[%s1519_s5 + $0x28] sm:$0xff]  ;;  %v1032_v40 = vld [vmem:[%s1519_s5 + $0x30] sm:$0xff] }
  0x16   :  { %1235 = vmatpush3.bf16.msk.msra.mxu1 %vm1231_vm4, %v1230_v11  ;;  %v1256_v39 = vpack.c.bf16 %v1031_v36, %v1030_v35  ;;  %v1033_v41 = vld [vmem:[%s1519_s5 + $0x38] sm:$0xff]  ;;  %v1039_v50 = vld [vmem:[%s1519_s5 + $0x40] sm:$0xff]  ;;  %v1040_v51 = vld [vmem:[%s1519_s5 + $0x48] sm:$0xff]  ;;  %v1319_v11 = vmov 0.0|0.0  }
  0x17   :  { %1223 = vmatpush3.bf16.msra.mxu0 %v1220_v5  ;;  %v1260_v42 = vpack.c.bf16 %v1033_v41, %v1032_v40  ;;  %v1270_v54 = vpack.c.bf16 %v1040_v51, %v1039_v50  ;;  %v1041_v55 = vld [vmem:[%s1519_s5 + $0x50] sm:$0xff]  ;;  %v1042_v56 = vld [vmem:[%s1519_s5 + $0x58] sm:$0xff]  ;;  %v1048_v1 = vld [vmem:[%s1519_s5 + $0x60] sm:$0xff] }
  0x18   :  { %1226 = vmatprep.subr.msk.bf16.mxu0 %vm1398_vm5, %v1224_v12  ;;  %v1274_v57 = vpack.c.bf16 %v1042_v56, %v1041_v55  ;;  %v1049_v2 = vld [vmem:[%s1519_s5 + $0x68] sm:$0xff]  ;;  %v1050_v6 = vld [vmem:[%s1519_s5 + $0x70] sm:$0xff]  ;;  %v1051_v7 = vld [vmem:[%s1519_s5 + $0x78] sm:$0xff]  ;;  %v1007_v35 = vstv %s1059_s16 }
  0x19   :  { %v1284_v5 = vpack.c.bf16 %v1049_v2, %v1048_v1  ;;  %v1288_v8 = vpack.c.bf16 %v1051_v7, %v1050_v6 }
  0x1b   :  { %1229 = vmatpush3.bf16.msk.msra.mxu0 %vm1398_vm5, %v1224_v12  ;;  %v1321_v12 = vmov 0.0  }
  0x1e   :  { %1128 = vmatmul.mubr.msk.f32.vlgmr.msra.gmra.mrb[0].mxu0 %vm50_vm0, %v43_v14 }
  0x1f   :  { %1159 = vmatprep.mubr.msk.f32.mxu0 %vm226_vm7, %v224_v17 }
  0xf1   :  { %v1129_v15 = vpop.f32.mrb[0].mxu0 }
  0xf2   :  { %v127_v16 = vpop.f32.mrb[1].mxu0 }
  0xf3   :  { %1134 = vmatprep.mubr.msk.f32.mxu1 %vm138_vm6, %v127_v16 }
  0xf4   :  { %1135 = vmatmul.mubr.msk.f32.vlgmr.msra.gmra.mrb[0].mxu1 %vm138_vm6, %v1129_v15 }
  0xf5   :  { %1141 = vmatprep.mubr.msk.f32.mxu1 %vm226_vm7, %v224_v17 }
 0x1c7   :  { %v1136_v20 = vpop.f32.mrb[0].mxu1 }
 0x1c8   :  { %v215_v21 = vpop.f32.mrb[1].mxu1 }
 0x1c9   :  { %v1236_v22 = vpack.c.bf16 %v1136_v20, %v215_v21  ;;  %v905_v21 = vld [vmem:[%s1517_s3] sm:$0x3]  ;;  %s1058_s3 = sld [smem:[#allocation2 + $0x2]] }
 0x1cb   :  { %1238 = vmatprep.subr.msk.bf16.mxu1 %vm1398_vm5, %v1236_v22 }
 0x1cc   :  { %1241 = vmatpush3.bf16.msk.msra.mxu1 %vm1398_vm5, %v1236_v22  ;;  %v1056_v22 = vld [vmem:[%s1520_s6] ss:$0 sm:$0xff] }
 0x1cd   :  { %1243 = vmatprep.subr.bf16.mxu1 %v1242_v23 }
 0x1cf   :  { %1142 = vmatmul.mubr.msk.f32.vlgmr.msra.gmra.mrb[2].mxu1 %vm226_vm7, %v1434_v26 }
 0x1d0   :  { %1245 = vmatpush3.bf16.msra.mxu1 %v1242_v23 }
 0x1d1   :  { %1247 = vmatprep.subr.bf16.mxu1 %v1246_v27 }
 0x1d4   :  { %1249 = vmatpush3.bf16.msra.mxu1 %v1246_v27 }
 0x2a2   :  { %v1143_v28 = vpop.f32.mrb[2].mxu1 }
 0x2a3   :  { %v302_v29 = vpop.f32.mrb[3].mxu1 }
 0x2a4   :  { %1152 = vmatprep.mubr.msk.f32.mxu1 %vm315_vm8, %v302_v29 }
 0x2a5   :  { %1153 = vmatmul.mubr.msk.f32.vlgmr.msra.gmra.mrb[4].mxu1 %vm315_vm8, %v1143_v28  ;;  %v1000_v28 = vstv %s994_s2 }
 0x2a6   :  { %1177 = vmatprep.mubr.msk.f32.mxu1 %vm226_vm7, %v224_v17 }
 0x378   :  { %v1154_v30 = vpop.f32.mrb[4].mxu1 }
 0x379   :  { %v398_v31 = vmul.f32 0.01, %v1154_v30  ;;  %v388_v32 = vpop.f32.mrb[5].mxu1 }
 0x37a   :  { %v397_v33 = vmul.f32 0.01, %v388_v32 }
 0x37b   :  { %v400_v34 = vmax.f32 %v1154_v30, %v398_v31  ;;  %v1002_v30 = vstv %s1057_s15 }
 0x37c   :  { %v399_v37 = vmax.f32 %v388_v32, %v397_v33  ;;  %v1005_v33 = vstv %s1058_s3 }
 0x37e   :  { %v1250_v38 = vpack.c.bf16 %v400_v34, %v399_v37 }
 0x380   :  { %1252 = vmatprep.subr.msk.bf16.mxu0 %vm1398_vm5, %v1250_v38 }
 0x381   :  { %1255 = vmatpush3.bf16.msk.msra.mxu0 %vm1398_vm5, %v1250_v38 }
 0x382   :  { %1257 = vmatprep.subr.bf16.mxu0 %v1256_v39 }
 0x384   :  { %1160 = vmatmul.mubr.msk.f32.vlgmr.msra.gmra.mrb[2].mxu0 %vm226_vm7, %v1434_v26 }
 0x385   :  { %1259 = vmatpush3.bf16.msra.mxu0 %v1256_v39 }
 0x386   :  { %1261 = vmatprep.subr.bf16.mxu0 %v1260_v42 }
 0x389   :  { %1263 = vmatpush3.bf16.msra.mxu0 %v1260_v42 }
 0x457   :  { %v1161_v43 = vpop.f32.mrb[2].mxu0 }
 0x458   :  { %v470_v44 = vpop.f32.mrb[3].mxu0 }
 0x459   :  { %1170 = vmatprep.mubr.msk.f32.mxu0 %vm315_vm8, %v470_v44 }
 0x45a   :  { %1171 = vmatmul.mubr.msk.f32.vlgmr.msra.gmra.mrb[4].mxu0 %vm315_vm8, %v1161_v43 }
 0x45b   :  { %1195 = vmatprep.mubr.msk.f32.mxu0 %vm226_vm7, %v224_v17 }
 0x52d   :  { %v1172_v45 = vpop.f32.mrb[4].mxu0 }
 0x52e   :  { %v566_v46 = vmul.f32 0.01, %v1172_v45  ;;  %v556_v47 = vpop.f32.mrb[5].mxu0 }
 0x52f   :  { %v565_v48 = vmul.f32 0.01, %v556_v47 }
 0x530   :  { %v568_v49 = vmax.f32 %v1172_v45, %v566_v46 }
 0x531   :  { %v567_v52 = vmax.f32 %v556_v47, %v565_v48 }
 0x533   :  { %v1264_v53 = vpack.c.bf16 %v568_v49, %v567_v52 }
 0x535   :  { %1266 = vmatprep.subr.msk.bf16.mxu1 %vm1398_vm5, %v1264_v53 }
 0x536   :  { %1269 = vmatpush3.bf16.msk.msra.mxu1 %vm1398_vm5, %v1264_v53 }
 0x537   :  { %1271 = vmatprep.subr.bf16.mxu1 %v1270_v54 }
 0x539   :  { %1178 = vmatmul.mubr.msk.f32.vlgmr.msra.gmra.mrb[6].mxu1 %vm226_vm7, %v1434_v26 }
 0x53a   :  { %1273 = vmatpush3.bf16.msra.mxu1 %v1270_v54 }
 0x53b   :  { %1275 = vmatprep.subr.bf16.mxu1 %v1274_v57 }
 0x53e   :  { %1277 = vmatpush3.bf16.msra.mxu1 %v1274_v57 }
 0x53f   :  { %1292 = vmatprep.subr.bf16.mxu1 %v1319_v11 }
 0x60c   :  { %v1179_v58 = vpop.f32.mrb[6].mxu1 }
 0x60d   :  { %v638_v59 = vpop.f32.mrb[7].mxu1 }
 0x60e   :  { %1188 = vmatprep.mubr.msk.f32.mxu1 %vm315_vm8, %v638_v59 }
 0x60f   :  { %1189 = vmatmul.mubr.msk.f32.vlgmr.msra.gmra.mrb[8].mxu1 %vm315_vm8, %v1179_v58 }
 0x610   :  { %1213 = vmatprep.mubr.msk.f32.mxu1 %vm1320_vm9, %v1321_v12 }
 0x6e2   :  { %v1190_v60 = vpop.f32.mrb[8].mxu1 }
 0x6e3   :  { %v734_v61 = vmul.f32 0.01, %v1190_v60  ;;  %v724_v62 = vpop.f32.mrb[9].mxu1 }
 0x6e4   :  { %v733_v63 = vmul.f32 0.01, %v724_v62 }
 0x6e5   :  { %v736_v0 = vmax.f32 %v1190_v60, %v734_v61 }
 0x6e6   :  { %v735_v3 = vmax.f32 %v724_v62, %v733_v63 }
 0x6e8   :  { %v1278_v4 = vpack.c.bf16 %v736_v0, %v735_v3 }
 0x6ea   :  { %1280 = vmatprep.subr.msk.bf16.mxu0 %vm1398_vm5, %v1278_v4 }
 0x6eb   :  { %1283 = vmatpush3.bf16.msk.msra.mxu0 %vm1398_vm5, %v1278_v4 }
 0x6ec   :  { %1285 = vmatprep.subr.bf16.mxu0 %v1284_v5 }
 0x6ee   :  { %1196 = vmatmul.mubr.msk.f32.vlgmr.msra.gmra.mrb[6].mxu0 %vm226_vm7, %v1434_v26 }
 0x6ef   :  { %1287 = vmatpush3.bf16.msra.mxu0 %v1284_v5 }
 0x6f0   :  { %1289 = vmatprep.subr.bf16.mxu0 %v1288_v8 }
 0x6f3   :  { %1291 = vmatpush3.bf16.msra.mxu0 %v1288_v8 }
 0x7c1   :  { %v1197_v9 = vpop.f32.mrb[6].mxu0 }
 0x7c2   :  { %v806_v10 = vpop.f32.mrb[7].mxu0 }
 0x7c3   :  { %1206 = vmatprep.mubr.msk.f32.mxu0 %vm315_vm8, %v806_v10 }
 0x7c4   :  { %1207 = vmatmul.mubr.msk.f32.vlgmr.msra.gmra.mrb[8].mxu0 %vm315_vm8, %v1197_v9 }
 0x897   :  { %v1208_v14 = vpop.f32.mrb[8].mxu0 }
 0x898   :  { %v902_v15 = vmul.f32 0.01, %v1208_v14  ;;  %v892_v16 = vpop.f32.mrb[9].mxu0 }
 0x899   :  { %v901_v17 = vmul.f32 0.01, %v892_v16 }
 0x89a   :  { %v904_v18 = vmax.f32 %v1208_v14, %v902_v15 }
 0x89b   :  { %v903_v19 = vmax.f32 %v892_v16, %v901_v17 }
 0x89d   :  { %v1293_v20 = vpack.c.bf16 %v904_v18, %v903_v19 }
 0x89f   :  { %1295 = vmatpush3.bf16.msk.msra.mxu1 %vm1398_vm5, %v1293_v20 }
 0x8a2   :  { %1214 = vmatmul.mubr.msk.f32.vlgmr.msra.gmra.mrb[10].mxu1 %vm226_vm7, %v905_v21 }
 0x975   :  { %v978_v23 = vpop.f32.mrb[10].mxu1 }
 0x976   :  { %v989_v24 = vmul.f32 %v1056_v22, %v978_v23  ;;  %v1215_v25 = vpop.f32.mrb[11].mxu1 }
 0x978   :  { %v991_v26 = vsel %vm990_vm10, %v989_v24, 0.0 }
 0x979   :  { %992 = vadd.xlane.f32.xlu0 %v991_v26 }
 0xa06   :  { %v993_v13 = vpop.xlane.xlu0 %992 }
 0xa07   :  { %v998_v27 = vsub.f32 %v993_v13, %v993_v13 }
 0xa09   :  { %v999_v29 = vmul.f32 316.22778, %v998_v27 }
 0xa0b   :  { %v1001_v31 = vmul.f32 %v1000_v28, %v999_v29 }
 0xa0d   :  { %v1003_v32 = vadd.f32 %v1002_v30, %v1001_v31 }
 0xa0f   :  { %1301 = vtanh.f32 %v1003_v32 }
 0xa19   :  { %v1302_v34 = vpop.eup %1301 }
 0xa1a   :  { %v1006_v36 = vmul.f32 %v1302_v34, %v1005_v33 }
 0xa1c   :  { %v1008_v37 = vadd.f32 %v1007_v35, %v1006_v36 }
 0xa1e   :  { %1010 = vst.msk [vmem:[%s1522_s8] sm:$0x3] %vm1009_vm11, %v1008_v37 }
 0xa1f   :  { %1015 = vsyncpa [#allocation3], 1 }

</bundles_post_ra>
